<compile_context>
chip_gen: v7x
topology: tpu7x:2x2x1
jax: 0.10.0
libtpu: 0.0.40
codegen_flags: <defaults>
</compile_context>

<pallas_src>
import jax
import jax.numpy as jnp
from jax.experimental import pallas as pl
from jax.experimental.pallas import tpu as pltpu

HIDDEN = 256
LANE = 128


def _round_up(n, m):
    return ((n + m - 1) // m) * m


def _choose_tiling(batch):
    """Return (padded_batch, tile_b, num_blocks) for the batch grid axis."""
    if batch <= 512:
        # Typical DQN batch: one grid step. Block == full array (no (8,128)
        # divisibility constraint); round rows to 16 for bf16 sublane packing.
        batch_p = _round_up(max(batch, 1), 16)
        return batch_p, batch_p, 1
    # Large batches: big tiles (multiples of 256 for v6e's 2x256x256 MXU,
    # capped at 2048 rows -> <6 MiB live VMEM incl. double-buffered I/O) while
    # keeping at least 2 grid blocks so the "parallel" batch axis can be split
    # across v7x's two TensorCores.
    tile_b = min(2048, 256 * max(1, (batch // 2) // 256))
    batch_p = _round_up(batch, tile_b)
    return batch_p, tile_b, batch_p // tile_b


def dqn_kernel(x_ref, w1_ref, b1_ref, w2_ref, b2_ref, w3_ref, b3_ref, out_ref):
    # Layer 1: Linear + ReLU. bf16 operands -> MXU, f32 accumulate, f32 bias/ReLU.
    h1 = jnp.dot(x_ref[...], w1_ref[...], preferred_element_type=jnp.float32)
    h1 = jnp.maximum(h1 + b1_ref[...], 0.0).astype(jnp.bfloat16)
    # Layer 2: Linear + ReLU.
    h2 = jnp.dot(h1, w2_ref[...], preferred_element_type=jnp.float32)
    h2 = jnp.maximum(h2 + b2_ref[...], 0.0).astype(jnp.bfloat16)
    # Layer 3: Linear (no activation). Output tile is lane-dense (padded to 128).
    h3 = jnp.dot(h2, w3_ref[...], preferred_element_type=jnp.float32)
    out_ref[...] = (h3 + b3_ref[...]).astype(out_ref.dtype)


def prepare_dqn_params(params):
    """One-time packing of parameters for the kernel (hoisted off the hot path).

    Weights -> bf16 (MXU operands), biases -> f32 (1, out), action dim
    zero-padded to a lane-dense multiple of 128. The obs dim is NOT padded.
    """
    n_obs = params["w1"].shape[0]
    n_actions = params["w3"].shape[1]
    act_p = _round_up(n_actions, LANE)
    bf = jnp.bfloat16
    w3 = jnp.zeros((HIDDEN, act_p), bf).at[:, :n_actions].set(params["w3"].astype(bf))
    b3 = jnp.zeros((1, act_p), jnp.float32).at[:, :n_actions].set(
        params["b3"].astype(jnp.float32).reshape(1, n_actions))
    return {
        "w1": params["w1"].astype(bf),                       # (n_obs, 256)
        "b1": params["b1"].astype(jnp.float32).reshape(1, HIDDEN),
        "w2": params["w2"].astype(bf),                        # (256, 256)
        "b2": params["b2"].astype(jnp.float32).reshape(1, HIDDEN),
        "w3": w3,                                             # (256, act_p)
        "b3": b3,                                             # (1, act_p)
        "n_obs": n_obs,
        "n_actions": n_actions,
        "act_p": act_p,
    }


def dqn_forward(x, packed):
    """x: (batch, n_observations) f32. packed: output of prepare_dqn_params."""
    batch, n_obs = x.shape
    assert n_obs == packed["n_obs"], (n_obs, packed["n_obs"])
    n_actions = packed["n_actions"]
    act_p = packed["act_p"]

    batch_p, tile_b, num_blocks = _choose_tiling(batch)

    # Stream x as bf16 (halves input DMA bytes vs f32, no lane padding);
    # pad only a ragged batch tail instead of materializing a full padded copy.
    x_bf = x.astype(jnp.bfloat16)
    if batch_p != batch:
        x_bf = jnp.pad(x_bf, ((0, batch_p - batch), (0, 0)))

    flops = 2 * batch_p * (n_obs * HIDDEN + HIDDEN * HIDDEN + HIDDEN * act_p)
    bytes_accessed = (batch_p * n_obs * 2
                      + (packed["w1"].size + packed["w2"].size + packed["w3"].size) * 2
                      + (packed["b1"].size + packed["b2"].size + packed["b3"].size) * 4
                      + batch_p * act_p * 2)

    # Weights/biases: full-array blocks, constant index_map -> VMEM-resident
    # across grid steps (only DMA'd once).
    resident = lambda shape: pl.BlockSpec(shape, lambda i: (0, 0))

    out_p = pl.pallas_call(
        dqn_kernel,
        out_shape=jax.ShapeDtypeStruct((batch_p, act_p), jnp.bfloat16),
        grid=(num_blocks,),
        in_specs=[
            # x tile: pipelined over the batch axis; obs dim unpadded
            # (full-array-dim exception to the 128-lane rule).
            pl.BlockSpec((tile_b, n_obs), lambda i: (i, 0)),
            resident((n_obs, HIDDEN)),      # w1
            resident((1, HIDDEN)),          # b1
            resident((HIDDEN, HIDDEN)),     # w2
            resident((1, HIDDEN)),          # b2
            resident((HIDDEN, act_p)),      # w3
            resident((1, act_p)),           # b3
        ],
        out_specs=pl.BlockSpec((tile_b, act_p), lambda i: (i, 0)),
        compiler_params=pltpu.CompilerParams(
            dimension_semantics=("parallel",)),
        cost_estimate=pl.CostEstimate(
            flops=flops, transcendentals=0, bytes_accessed=bytes_accessed),
    )(x_bf, packed["w1"], packed["b1"], packed["w2"], packed["b2"],
      packed["w3"], packed["b3"])

    # Slice away lane/row padding; return f32 Q-values (tiny tensor).
    return out_p[:batch, :n_actions].astype(jnp.float32)


def init_dqn_params(key, n_observations, n_actions):
    """Matches torch: uniform_(-0.001, 0.001) for all weights and biases.
    Weights stored as (in, out) = PyTorch weight.T; biases as (1, out)."""
    ks = jax.random.split(key, 6)
    u = lambda k, shape: jax.random.uniform(
        k, shape, dtype=jnp.float32, minval=-0.001, maxval=0.001)
    return {
        "w1": u(ks[0], (n_observations, HIDDEN)),
        "b1": u(ks[1], (1, HIDDEN)),
        "w2": u(ks[2], (HIDDEN, HIDDEN)),
        "b2": u(ks[3], (1, HIDDEN)),
        "w3": u(ks[4], (HIDDEN, n_actions)),
        "b3": u(ks[5], (1, n_actions)),
    }


def dqn_reference_f32(x, params):
    h1 = jnp.maximum(x @ params["w1"] + params["b1"], 0.0)
    h2 = jnp.maximum(h1 @ params["w2"] + params["b2"], 0.0)
    return h2 @ params["w3"] + params["b3"]


def dqn_reference_bf16(x, params):
    """Pure-JAX reference mirroring the kernel math (bf16 operands/intermediates,
    f32 accumulate, bf16 output store)."""
    bf, f32 = jnp.bfloat16, jnp.float32
    h1 = jnp.maximum(
        jnp.dot(x.astype(bf), params["w1"].astype(bf),
                preferred_element_type=f32) + params["b1"], 0.0).astype(bf)
    h2 = jnp.maximum(
        jnp.dot(h1, params["w2"].astype(bf),
                preferred_element_type=f32) + params["b2"], 0.0).astype(bf)
    out = jnp.dot(h2, params["w3"].astype(bf),
                  preferred_element_type=f32) + params["b3"]
    return out.astype(bf).astype(f32)   # mirror the kernel's bf16 output store


if __name__ == "__main__":
    batch = 8
    n_observations = 32
    n_actions = 8

    key = jax.random.PRNGKey(0)
    k_params, k_x = jax.random.split(key)
    params = init_dqn_params(k_params, n_observations, n_actions)
    x = jax.random.normal(k_x, (batch, n_observations), dtype=jnp.float32)

    packed = prepare_dqn_params(params)      # one-time, off the hot path
    out = dqn_forward(x, packed)
    jax.block_until_ready(out)
    assert out.shape == (batch, n_actions), out.shape

    # Tight check vs a reference that mirrors the kernel's bf16/f32 math.
    ref_bf16 = dqn_reference_bf16(x, params)
    assert jnp.allclose(out, ref_bf16, atol=1e-6, rtol=1e-2), "mismatch vs bf16 reference"

    # Loose check vs the full-f32 reference (documents bf16 operand accuracy loss).
    ref_f32 = dqn_reference_f32(x, params)
    assert jnp.allclose(out, ref_f32, atol=2e-5, rtol=5e-2), "mismatch vs f32 reference"

    print("KERNEL_OK")
</pallas_src>

<mosaic_0001>
module attributes {stable_mosaic.version = 11 : i64} {
  func.func @dqn_kernel(%arg0: i32, %arg1: memref<16x32xbf16, #tpu.memory_space<vmem>>, %arg2: memref<32x256xbf16, #tpu.memory_space<vmem>>, %arg3: memref<1x256xf32, #tpu.memory_space<vmem>>, %arg4: memref<256x256xbf16, #tpu.memory_space<vmem>>, %arg5: memref<1x256xf32, #tpu.memory_space<vmem>>, %arg6: memref<256x128xbf16, #tpu.memory_space<vmem>>, %arg7: memref<1x128xf32, #tpu.memory_space<vmem>>, %arg8: memref<16x128xbf16, #tpu.memory_space<vmem>>) attributes {dimension_semantics = [#tpu.dimension_semantics<parallel>], iteration_bounds = array<i64: 1>, scalar_prefetch = 0 : i64, scratch_operands = 0 : i64, tpu.core_type = #tpu.core_type<tc>, window_params = [{transform_indices = @transform_0, window_bounds = array<i64: 16, 32>}, {pipeline_mode = #tpu.pipeline_mode<synchronous>, transform_indices = @transform_1, window_bounds = array<i64: 32, 256>}, {pipeline_mode = #tpu.pipeline_mode<synchronous>, transform_indices = @transform_2, window_bounds = array<i64: 1, 256>}, {pipeline_mode = #tpu.pipeline_mode<synchronous>, transform_indices = @transform_3, window_bounds = array<i64: 256, 256>}, {pipeline_mode = #tpu.pipeline_mode<synchronous>, transform_indices = @transform_4, window_bounds = array<i64: 1, 256>}, {pipeline_mode = #tpu.pipeline_mode<synchronous>, transform_indices = @transform_5, window_bounds = array<i64: 256, 128>}, {pipeline_mode = #tpu.pipeline_mode<synchronous>, transform_indices = @transform_6, window_bounds = array<i64: 1, 128>}, {transform_indices = @transform_7, window_bounds = array<i64: 16, 128>}]} {
    %c0 = arith.constant 0 : index
    %c0_0 = arith.constant 0 : index
    %0 = vector.load %arg1[%c0, %c0_0] : memref<16x32xbf16, #tpu.memory_space<vmem>>, vector<16x32xbf16>
    %c0_1 = arith.constant 0 : index
    %c0_2 = arith.constant 0 : index
    %1 = vector.load %arg2[%c0_1, %c0_2] : memref<32x256xbf16, #tpu.memory_space<vmem>>, vector<32x256xbf16>
    %cst = arith.constant dense<0.000000e+00> : vector<16x256xf32>
    %2 = tpu.matmul %0, %1, %cst {dimension_numbers = #tpu.dot_dimension_numbers<[1], [0], [0], [1], [0, 0, 1, 1], [], []>} : vector<16x32xbf16>, vector<32x256xbf16>, vector<16x256xf32> -> vector<16x256xf32>
    %c0_3 = arith.constant 0 : index
    %c0_4 = arith.constant 0 : index
    %3 = vector.load %arg3[%c0_3, %c0_4] : memref<1x256xf32, #tpu.memory_space<vmem>>, vector<1x256xf32>
    %4 = vector.broadcast %3 : vector<1x256xf32> to vector<16x256xf32>
    %5 = arith.addf %2, %4 : vector<16x256xf32>
    %cst_5 = arith.constant 0.000000e+00 : f32
    %6 = vector.broadcast %cst_5 : f32 to vector<16x256xf32>
    %7 = arith.maximumf %5, %6 : vector<16x256xf32>
    %8 = arith.truncf %7 : vector<16x256xf32> to vector<16x256xbf16>
    %c0_6 = arith.constant 0 : index
    %c0_7 = arith.constant 0 : index
    %9 = vector.load %arg4[%c0_6, %c0_7] : memref<256x256xbf16, #tpu.memory_space<vmem>>, vector<256x256xbf16>
    %cst_8 = arith.constant dense<0.000000e+00> : vector<16x256xf32>
    %10 = tpu.matmul %8, %9, %cst_8 {dimension_numbers = #tpu.dot_dimension_numbers<[1], [0], [0], [1], [0, 0, 1, 1], [], []>} : vector<16x256xbf16>, vector<256x256xbf16>, vector<16x256xf32> -> vector<16x256xf32>
    %c0_9 = arith.constant 0 : index
    %c0_10 = arith.constant 0 : index
    %11 = vector.load %arg5[%c0_9, %c0_10] : memref<1x256xf32, #tpu.memory_space<vmem>>, vector<1x256xf32>
    %12 = vector.broadcast %11 : vector<1x256xf32> to vector<16x256xf32>
    %13 = arith.addf %10, %12 : vector<16x256xf32>
    %cst_11 = arith.constant 0.000000e+00 : f32
    %14 = vector.broadcast %cst_11 : f32 to vector<16x256xf32>
    %15 = arith.maximumf %13, %14 : vector<16x256xf32>
    %16 = arith.truncf %15 : vector<16x256xf32> to vector<16x256xbf16>
    %c0_12 = arith.constant 0 : index
    %c0_13 = arith.constant 0 : index
    %17 = vector.load %arg6[%c0_12, %c0_13] : memref<256x128xbf16, #tpu.memory_space<vmem>>, vector<256x128xbf16>
    %cst_14 = arith.constant dense<0.000000e+00> : vector<16x128xf32>
    %18 = tpu.matmul %16, %17, %cst_14 {dimension_numbers = #tpu.dot_dimension_numbers<[1], [0], [0], [1], [0, 0, 1, 1], [], []>} : vector<16x256xbf16>, vector<256x128xbf16>, vector<16x128xf32> -> vector<16x128xf32>
    %c0_15 = arith.constant 0 : index
    %c0_16 = arith.constant 0 : index
    %19 = vector.load %arg7[%c0_15, %c0_16] : memref<1x128xf32, #tpu.memory_space<vmem>>, vector<1x128xf32>
    %20 = vector.broadcast %19 : vector<1x128xf32> to vector<16x128xf32>
    %21 = arith.addf %18, %20 : vector<16x128xf32>
    %22 = arith.truncf %21 : vector<16x128xf32> to vector<16x128xbf16>
    %c0_17 = arith.constant 0 : index
    %c0_18 = arith.constant 0 : index
    %23 = vector.load %arg8[%c0_17, %c0_18] : memref<16x128xbf16, #tpu.memory_space<vmem>>, vector<16x128xbf16>
    tpu.vector_store %arg8[%c0_17, %c0_18], %22 {strides = array<i32>} : memref<16x128xbf16, #tpu.memory_space<vmem>>, vector<16x128xbf16>,
    return
  }
  func.func @transform_0(%arg0: i32) -> (i32, i32) {
    %c0_i32 = arith.constant 0 : i32
    %c0_i32_0 = arith.constant 0 : i32
    return %arg0, %c0_i32 : i32, i32
  }
  func.func @transform_1(%arg0: i32) -> (i32, i32) {
    %c0_i32 = arith.constant 0 : i32
    %c0_i32_0 = arith.constant 0 : i32
    %c0_i32_1 = arith.constant 0 : i32
    return %c0_i32, %c0_i32_0 : i32, i32
  }
  func.func @transform_2(%arg0: i32) -> (i32, i32) {
    %c0_i32 = arith.constant 0 : i32
    %c0_i32_0 = arith.constant 0 : i32
    %c0_i32_1 = arith.constant 0 : i32
    return %c0_i32, %c0_i32_0 : i32, i32
  }
  func.func @transform_3(%arg0: i32) -> (i32, i32) {
    %c0_i32 = arith.constant 0 : i32
    %c0_i32_0 = arith.constant 0 : i32
    %c0_i32_1 = arith.constant 0 : i32
    return %c0_i32, %c0_i32_0 : i32, i32
  }
  func.func @transform_4(%arg0: i32) -> (i32, i32) {
    %c0_i32 = arith.constant 0 : i32
    %c0_i32_0 = arith.constant 0 : i32
    %c0_i32_1 = arith.constant 0 : i32
    return %c0_i32, %c0_i32_0 : i32, i32
  }
  func.func @transform_5(%arg0: i32) -> (i32, i32) {
    %c0_i32 = arith.constant 0 : i32
    %c0_i32_0 = arith.constant 0 : i32
    %c0_i32_1 = arith.constant 0 : i32
    return %c0_i32, %c0_i32_0 : i32, i32
  }
  func.func @transform_6(%arg0: i32) -> (i32, i32) {
    %c0_i32 = arith.constant 0 : i32
    %c0_i32_0 = arith.constant 0 : i32
    %c0_i32_1 = arith.constant 0 : i32
    return %c0_i32, %c0_i32_0 : i32, i32
  }
  func.func @transform_7(%arg0: i32) -> (i32, i32) {
    %c0_i32 = arith.constant 0 : i32
    %c0_i32_0 = arith.constant 0 : i32
    return %arg0, %c0_i32 : i32, i32
  }
}

</mosaic_0001>

<bundles_post_ra>
// kernel: tpu_custom_call.1
= control target key start
LH: loop header
LB: loop body
LE: loop exit
PB: predicated region body
PF: predicated region fallthrough
CT: control target
= control target key end

     0   :  { %12 = vsyncpa [#allocation3], 0  ;;  %s1063_s0 = inlined_call_operand.hbm [shape: bf16[16,32], index: 0, kind: input, shape index: {}]   ;;  %s1064_s1 = inlined_call_operand.hbm [shape: bf16[32,256], index: 1, kind: input, shape index: {}]   ;;  %s1065_s2 = inlined_call_operand.vmem [shape: f32[1,256], index: 2, kind: input, shape index: {}]   ;;  %s1066_s3 = inlined_call_operand.hbm [shape: bf16[256,256], index: 3, kind: input, shape index: {}]   ;;  %s1067_s4 = inlined_call_operand.vmem [shape: f32[1,256], index: 4, kind: input, shape index: {}]   ;;  %s1068_s5 = inlined_call_operand.hbm [shape: bf16[256,128], index: 5, kind: input, shape index: {}]   ;;  %s1069_s6 = inlined_call_operand.vmem [shape: f32[1,128], index: 6, kind: input, shape index: {}]   ;;  %s1070_s7 = inlined_call_operand.hbm [shape: bf16[16,128], index: 7, kind: output, shape index: {}]  }
   0x1   :  { %13 = vsyncpa [#allocation6], 0 }
   0x2   :  { %14 = vsyncpa [#allocation9], 0 }
   0x3   :  { %15 = vsyncpa [#allocation4], 0  ;;  %s922_s24 = smov [#allocation5]   ;;  %s804_s28 = scalar_lea.hbm %s1064_s1, 512 }
   0x4   :  { %s33_s25 = sshll.u32 %s922_s24, 4  ;;  %p805_p0 = scmp.ne.s32.totalorder %s1064_s1, %s804_s28  ;;  %s34_s25 = int_to_ptr.vmem [resolvable:$true] %s33_s25 }
   0x5   :  { %p808_p1 = scmp.lt.u32.totalorder %s804_s28, %s1064_s1 }
   0x7   :  { %p810_p2 = pnand %p808_p1, %p805_p0 }
   0x9   :  { %813 = shalt.err (!%p810_p2)
}
   0xa   :  { %s814_s10 = scalar_lea.vmem %s34_s25, 512  ;;  %p819_p4 = scmp.lt.s32.totalorder %s34_s25, %s34_s25 }
   0xb   :  { %p815_p3 = scmp.ne.s32.totalorder %s34_s25, %s814_s10  ;;  %p820_p5 = scmp.lt.s32.totalorder %s814_s10, %s814_s10 }
   0xd   :  { %p821_p6 = por %p820_p5, %p819_p4 }
   0xf   :  { %p822_p7 = pnand %p821_p6, %p815_p3 }
  0x11   :  { %825 = shalt.err (!%p822_p7)
}
  0x12   :  { %s923_s11 = smov 128   ;;  %s924_s12 = smov 8  }
  0x13   :  { %39 = dma.hbm_to_vmem [thread:$0]  %s1064_s1, 512, %s34_s25, [#allocation6], %s923_s11, %s923_s11, %s924_s12  }
  0x14   :  { %s925_s15 = smov [#allocation2]   ;;  %s826_s19 = scalar_lea.hbm %s1063_s0, 128 }
  0x15   :  { %s21_s16 = sshll.u32 %s925_s15, 4  ;;  %p827_p8 = scmp.ne.s32.totalorder %s1063_s0, %s826_s19  ;;  %s22_s16 = int_to_ptr.vmem [resolvable:$true] %s21_s16 }
  0x16   :  { %p830_p9 = scmp.lt.u32.totalorder %s826_s19, %s1063_s0 }
  0x18   :  { %p832_p10 = pnand %p830_p9, %p827_p8 }
  0x1a   :  { %835 = shalt.err (!%p832_p10)
}
  0x1b   :  { %s836_s24 = scalar_lea.vmem %s22_s16, 128  ;;  %p841_p12 = scmp.lt.s32.totalorder %s22_s16, %s22_s16 }
  0x1c   :  { %p837_p11 = scmp.ne.s32.totalorder %s22_s16, %s836_s24  ;;  %p842_p13 = scmp.lt.s32.totalorder %s836_s24, %s836_s24 }
  0x1e   :  { %p843_p0 = por %p842_p13, %p841_p12 }
  0x20   :  { %p844_p1 = pnand %p843_p0, %p837_p11 }
  0x22   :  { %847 = shalt.err (!%p844_p1)
}
  0x23   :  { %s926_s1 = smov 64   ;;  %s927_s25 = smov 4  }
  0x24   :  { %27 = dma.hbm_to_vmem [thread:$0]  %s1063_s0, 128, %s22_s16, [#allocation3], %s926_s1, %s926_s1, %s927_s25  }
  0x25   :  { %s928_s28 = smov [#allocation7]   ;;  %s929_s30 = smov [#allocation8]  }
  0x26   :  { %s47_s29 = sshll.u32 %s928_s28, 4  ;;  %s61_s8 = sshll.u32 %s929_s30, 4  ;;  %s48_s29 = int_to_ptr.vmem [resolvable:$true] %s47_s29  ;;  %s1002_s8 = int_to_ptr.vmem [resolvable:$true] %s61_s8 }
  0x27   :  { %s848_s13 = scalar_lea.hbm %s1066_s3, 4096 }
  0x28   :  { %p849_p2 = scmp.ne.s32.totalorder %s1066_s3, %s848_s13  ;;  %p852_p3 = scmp.lt.u32.totalorder %s848_s13, %s1066_s3 }
  0x2a   :  { %p854_p4 = pnand %p852_p3, %p849_p2 }
  0x2c   :  { %857 = shalt.err (!%p854_p4)
}
  0x2d   :  { %s858_s0 = scalar_lea.vmem %s48_s29, 4096  ;;  %p863_p6 = scmp.lt.s32.totalorder %s48_s29, %s48_s29 }
  0x2e   :  { %p859_p5 = scmp.ne.s32.totalorder %s48_s29, %s858_s0  ;;  %p864_p7 = scmp.lt.s32.totalorder %s858_s0, %s858_s0 }
  0x30   :  { %p865_p8 = por %p864_p7, %p863_p6 }
  0x32   :  { %p866_p9 = pnand %p865_p8, %p859_p5 }
  0x34   :  { %869 = shalt.err (!%p866_p9)
}
  0x35   :  { %53 = dma.hbm_to_vmem [thread:$0]  %s1066_s3, 4096, %s48_s29, [#allocation6], %s923_s11, %s923_s11, %s924_s12  }
  0x36   :  { %s870_s22 = scalar_lea.hbm %s1068_s5, 2048 }
  0x37   :  { %p871_p10 = scmp.ne.s32.totalorder %s1068_s5, %s870_s22  ;;  %p874_p11 = scmp.lt.u32.totalorder %s870_s22, %s1068_s5 }
  0x39   :  { %p876_p12 = pnand %p874_p11, %p871_p10 }
  0x3b   :  { %879 = shalt.err (!%p876_p12)
}
  0x3c   :  { %s880_s28 = scalar_lea.vmem %s1002_s8, 2048  ;;  %p885_p0 = scmp.lt.s32.totalorder %s1002_s8, %s1002_s8 }
  0x3d   :  { %p881_p13 = scmp.ne.s32.totalorder %s1002_s8, %s880_s28  ;;  %p886_p1 = scmp.lt.s32.totalorder %s880_s28, %s880_s28 }
  0x3f   :  { %p887_p2 = por %p886_p1, %p885_p0 }
  0x41   :  { %p888_p3 = pnand %p887_p2, %p881_p13 }
  0x43   :  { %891 = shalt.err (!%p888_p3)
}
  0x44   :  { %67 = dma.hbm_to_vmem [thread:$0]  %s1068_s5, 2048, %s1002_s8, [#allocation9], %s926_s1, %s926_s1, %s927_s25  }
  0x45   :  { %914 = dma.done.wait [#allocation3], 128  }
  0x46   :  { %915 = vsyncadd [#allocation3], 4294967168 }
  0x47   :  { %916 = dma.done.wait [#allocation6], 4608  }
  0x48   :  { %917 = vsyncadd [#allocation6], 4294962688 }
  0x49   :  { %918 = dma.done.wait [#allocation9], 2048  }
  0x4a   :  { %919 = vsyncadd [#allocation9], 4294965248  ;;  %v930_v0 = vmov 0   ;;  %v733_v1 = vld [vmem:[#allocation5 + $0x4] ss:$8 sps:$4 sm:$0xff]   ;;  %v739_v8 = vld [vmem:[#allocation2] sm:$0xff]   ;;  %v91_v49 = vlaneseq }
  0x4b   :  { %162 = vmatprep.mubr.bf16.mxu0 %v930_v0  ;;  %v735_v2 = vld [vmem:[#allocation5] ss:$8 sps:$4 sm:$0xff]   ;;  %130 = vmatprep.subr.bf16.mxu0 %v733_v1  ;;  %v736_v3 = vld [vmem:[#allocation5 + $0x14] ss:$8 sps:$4 sm:$0xff]   ;;  %v738_v4 = vld [vmem:[#allocation5 + $0x10] ss:$8 sps:$4 sm:$0xff]  }
  0x4c   :  { %131 = vmatpush1.bf16.msra.mxu0 %v735_v2  ;;  %v740_v5 = vld [vmem:[#allocation7 + $0x4] ss:$8 sps:$4 sm:$0xff]   ;;  %v742_v6 = vld [vmem:[#allocation7] ss:$8 sps:$4 sm:$0xff]   ;;  %v743_v7 = vld [vmem:[#allocation7 + $0x14] ss:$8 sps:$4 sm:$0xff]  }
  0x4d   :  { %132 = vmatprep.subr.bf16.mxu0 %v736_v3  ;;  %383 = vmatprep.subr.bf16.mxu1 %v740_v5  ;;  %vm126_vm0 = vcmask 261120   ;;  %v745_v9 = vld [vmem:[#allocation7 + $0x10] ss:$8 sps:$4 sm:$0xff]   ;;  %v746_v10 = vld [vmem:[#allocation7 + $0x24] ss:$8 sps:$4 sm:$0xff]   ;;  %v92_v50 = vshrl.u32 %v91_v49, 7 }
  0x4e   :  { %384 = vmatpush1.bf16.msra.mxu1 %v742_v6  ;;  %v748_v11 = vld [vmem:[#allocation7 + $0x20] ss:$8 sps:$4 sm:$0xff]   ;;  %v749_v12 = vld [vmem:[#allocation7 + $0x34] ss:$8 sps:$4 sm:$0xff]   ;;  %v751_v13 = vld [vmem:[#allocation7 + $0x30] ss:$8 sps:$4 sm:$0xff]  }
  0x4f   :  { %385 = vmatprep.subr.bf16.mxu1 %v743_v7  ;;  %v752_v14 = vld [vmem:[#allocation7 + $0x44] ss:$8 sps:$4 sm:$0xff]   ;;  %v754_v15 = vld [vmem:[#allocation7 + $0x40] ss:$8 sps:$4 sm:$0xff]   ;;  %v755_v16 = vld [vmem:[#allocation7 + $0x54] ss:$8 sps:$4 sm:$0xff]  }
  0x50   :  { %133 = vmatpush1.bf16.msra.mxu0 %v738_v4  ;;  %v757_v17 = vld [vmem:[#allocation7 + $0x50] ss:$8 sps:$4 sm:$0xff]   ;;  %v758_v18 = vld [vmem:[#allocation7 + $0x64] ss:$8 sps:$4 sm:$0xff]   ;;  %v760_v19 = vld [vmem:[#allocation7 + $0x60] ss:$8 sps:$4 sm:$0xff]  }
  0x51   :  { %v761_v20 = vld [vmem:[#allocation7 + $0x74] ss:$8 sps:$4 sm:$0xff]   ;;  %v763_v21 = vld [vmem:[#allocation7 + $0x70] ss:$8 sps:$4 sm:$0xff]   ;;  %v764_v22 = vld [vmem:[#allocation7 + $0x84] ss:$8 sps:$4 sm:$0xff]  }
  0x52   :  { %386 = vmatpush1.bf16.msra.mxu1 %v745_v9  ;;  %v766_v23 = vld [vmem:[#allocation7 + $0x80] ss:$8 sps:$4 sm:$0xff]   ;;  %v767_v24 = vld [vmem:[#allocation7 + $0x94] ss:$8 sps:$4 sm:$0xff]   ;;  %v769_v25 = vld [vmem:[#allocation7 + $0x90] ss:$8 sps:$4 sm:$0xff]  }
  0x53   :  { %642 = vmatmul.mubr.msk.bf16.vlgmr.msra.gmra.mrb[0].mxu0 %vm126_vm0, %v739_v8  ;;  %387 = vmatprep.subr.bf16.mxu1 %v746_v10  ;;  %v770_v26 = vld [vmem:[#allocation7 + $0xa4] ss:$8 sps:$4 sm:$0xff]   ;;  %v772_v27 = vld [vmem:[#allocation7 + $0xa0] ss:$8 sps:$4 sm:$0xff]   ;;  %v773_v28 = vld [vmem:[#allocation7 + $0xb4] ss:$8 sps:$4 sm:$0xff]  }
  0x54   :  { %v775_v29 = vld [vmem:[#allocation7 + $0xb0] ss:$8 sps:$4 sm:$0xff]   ;;  %v776_v30 = vld [vmem:[#allocation7 + $0xc4] ss:$8 sps:$4 sm:$0xff]   ;;  %v778_v31 = vld [vmem:[#allocation7 + $0xc0] ss:$8 sps:$4 sm:$0xff]  }
  0x55   :  { %v779_v32 = vld [vmem:[#allocation7 + $0xd4] ss:$8 sps:$4 sm:$0xff]   ;;  %v781_v33 = vld [vmem:[#allocation7 + $0xd0] ss:$8 sps:$4 sm:$0xff]   ;;  %v782_v34 = vld [vmem:[#allocation7 + $0xe4] ss:$8 sps:$4 sm:$0xff]  }
  0x56   :  { %388 = vmatpush1.bf16.msra.mxu1 %v748_v11  ;;  %v784_v35 = vld [vmem:[#allocation7 + $0xe0] ss:$8 sps:$4 sm:$0xff]   ;;  %v785_v36 = vld [vmem:[#allocation7 + $0xf4] ss:$8 sps:$4 sm:$0xff]   ;;  %v787_v37 = vld [vmem:[#allocation7 + $0xf0] ss:$8 sps:$4 sm:$0xff]  }
  0x57   :  { %389 = vmatprep.subr.bf16.mxu1 %v749_v12  ;;  %v788_v38 = vld [vmem:[#allocation8 + $0x40] sm:$0xff]   ;;  %v790_v40 = vld [vmem:[#allocation8 + $0x48] sm:$0xff]   ;;  %v792_v42 = vld [vmem:[#allocation8 + $0x50] sm:$0xff]   ;;  %v93_v51 = vsub.s32 0, %v92_v50  ;;  %v97_v53 = vsub.s32 1, %v92_v50  ;;  %s931_s8 = smov [#allocation10]  }
  0x58   :  { %v789_v39 = vld [vmem:[#allocation8] sm:$0xff]   ;;  %701 = vmatprep.subr.bf16.mxu0 %v788_v38  ;;  %v791_v41 = vld [vmem:[#allocation8 + $0x8] sm:$0xff]   ;;  %v793_v43 = vld [vmem:[#allocation8 + $0x10] sm:$0xff]   ;;  %s623_s9 = sshll.u32 %s931_s8, 4  ;;  %s624_s9 = int_to_ptr.vmem [resolvable:$true] %s623_s9 }
  0x59   :  { %702 = vmatpush3.bf16.msra.mxu0 %v789_v39  ;;  %v794_v44 = vld [vmem:[#allocation8 + $0x58] sm:$0xff]   ;;  %v796_v46 = vld [vmem:[#allocation8 + $0x60] sm:$0xff]   ;;  %v798_v48 = vld [vmem:[#allocation8 + $0x68] sm:$0xff]   ;;  %s892_s10 = scalar_lea.vmem %s624_s9, 128  ;;  %p897_p5 = scmp.lt.s32.totalorder %s624_s9, %s624_s9 }
  0x5a   :  { %390 = vmatpush1.bf16.msra.mxu1 %v751_v13  ;;  %703 = vmatprep.subr.bf16.mxu0 %v790_v40  ;;  %v795_v45 = vld [vmem:[#allocation8 + $0x18] sm:$0xff]   ;;  %v797_v47 = vld [vmem:[#allocation8 + $0x20] sm:$0xff]   ;;  %v799_v6 = vld [vmem:[#allocation8 + $0x28] sm:$0xff]   ;;  %p893_p4 = scmp.ne.s32.totalorder %s624_s9, %s892_s10  ;;  %p898_p6 = scmp.lt.s32.totalorder %s892_s10, %s892_s10 }
  0x5b   :  { %391 = vmatprep.subr.bf16.mxu1 %v752_v14  ;;  %v89_v52 = vld [vmem:[%s1065_s2] sm:$0x3]  ;;  %v800_v7 = vld [vmem:[#allocation8 + $0x70] sm:$0xff]  }
  0x5c   :  { %v94_v54 = vrot.slane %v89_v52, %v93_v51  ;;  %v98_v55 = vrot.slane %v89_v52, %v97_v53  ;;  %v801_v8 = vld [vmem:[#allocation8 + $0x30] sm:$0xff]   ;;  %v802_v9 = vld [vmem:[#allocation8 + $0x78] sm:$0xff]   ;;  %p899_p7 = por %p898_p6, %p897_p5 }
  0x5d   :  { %704 = vmatpush3.bf16.msra.mxu0 %v791_v41  ;;  %v803_v10 = vld [vmem:[#allocation8 + $0x38] sm:$0xff]  }
  0x5e   :  { %392 = vmatpush1.bf16.msra.mxu1 %v754_v15  ;;  %705 = vmatprep.subr.bf16.mxu0 %v792_v42  ;;  %v211_v11 = vld [vmem:[%s1067_s4] sm:$0x3]  ;;  %p900_p8 = pnand %p899_p7, %p893_p4 }
  0x5f   :  { %393 = vmatprep.subr.bf16.mxu1 %v755_v16  ;;  %v216_v12 = vrot.slane %v211_v11, %v93_v51  ;;  %v220_v13 = vrot.slane %v211_v11, %v97_v53 }
  0x61   :  { %706 = vmatpush3.bf16.msra.mxu0 %v793_v43 }
  0x62   :  { %394 = vmatpush1.bf16.msra.mxu1 %v757_v17  ;;  %707 = vmatprep.subr.bf16.mxu0 %v794_v44 }
  0x63   :  { %395 = vmatprep.subr.bf16.mxu1 %v758_v18 }
  0x65   :  { %708 = vmatpush3.bf16.msra.mxu0 %v795_v45 }
  0x66   :  { %396 = vmatpush1.bf16.msra.mxu1 %v760_v19  ;;  %709 = vmatprep.subr.bf16.mxu0 %v796_v46 }
  0x67   :  { %397 = vmatprep.subr.bf16.mxu1 %v761_v20 }
  0x69   :  { %710 = vmatpush3.bf16.msra.mxu0 %v797_v47 }
  0x6a   :  { %398 = vmatpush1.bf16.msra.mxu1 %v763_v21  ;;  %711 = vmatprep.subr.bf16.mxu0 %v798_v48 }
  0x6b   :  { %399 = vmatprep.subr.bf16.mxu1 %v764_v22 }
  0x6d   :  { %712 = vmatpush3.bf16.msra.mxu0 %v799_v6 }
  0x6e   :  { %400 = vmatpush1.bf16.msra.mxu1 %v766_v23  ;;  %713 = vmatprep.subr.bf16.mxu0 %v800_v7 }
  0x6f   :  { %401 = vmatprep.subr.bf16.mxu1 %v767_v24 }
  0x71   :  { %714 = vmatpush3.bf16.msra.mxu0 %v801_v8 }
  0x72   :  { %402 = vmatpush1.bf16.msra.mxu1 %v769_v25  ;;  %715 = vmatprep.subr.bf16.mxu0 %v802_v9 }
  0x73   :  { %403 = vmatprep.subr.bf16.mxu1 %v770_v26 }
  0x75   :  { %716 = vmatpush3.bf16.msra.mxu0 %v803_v10 }
  0x76   :  { %404 = vmatpush1.bf16.msra.mxu1 %v772_v27 }
  0x77   :  { %405 = vmatprep.subr.bf16.mxu1 %v773_v28 }
  0x7a   :  { %406 = vmatpush1.bf16.msra.mxu1 %v775_v29 }
  0x7b   :  { %407 = vmatprep.subr.bf16.mxu1 %v776_v30 }
  0x7e   :  { %408 = vmatpush1.bf16.msra.mxu1 %v778_v31 }
  0x7f   :  { %409 = vmatprep.subr.bf16.mxu1 %v779_v32  ;;  %v675_v32 = vld [vmem:[%s1069_s6] ss:$0 sm:$0xff] }
  0x82   :  { %410 = vmatpush1.bf16.msra.mxu1 %v781_v33 }
  0x83   :  { %411 = vmatprep.subr.bf16.mxu1 %v782_v34 }
  0x86   :  { %412 = vmatpush1.bf16.msra.mxu1 %v784_v35 }
  0x87   :  { %413 = vmatprep.subr.bf16.mxu1 %v785_v36 }
  0x8a   :  { %414 = vmatpush1.bf16.msra.mxu1 %v787_v37 }
 0x126   :  { %v164_v56 = vpop.f32.mrb[0].mxu0 }
 0x127   :  { %v165_v57 = vadd.f32 %v164_v56, %v94_v54  ;;  %v166_v58 = vpop.f32.mrb[1].mxu0 }
 0x128   :  { %v167_v59 = vadd.f32 %v166_v58, %v98_v55  ;;  %v168_v60 = vpop.f32.mrb[2].mxu0 }
 0x129   :  { %v169_v61 = vadd.f32 %v168_v60, %v94_v54  ;;  %v170_v62 = vpop.f32.mrb[3].mxu0  ;;  %v173_v0 = vmax.f32 %v165_v57, 0.0 }
 0x12a   :  { %v171_v63 = vadd.f32 %v170_v62, %v98_v55  ;;  %v174_v2 = vmax.f32 %v167_v59, 0.0 }
 0x12b   :  { %v175_v1 = vmax.f32 %v169_v61, 0.0 }
 0x12c   :  { %v176_v3 = vmax.f32 %v171_v63, 0.0 }
 0x12d   :  { %v177_v4 = vpack.c.bf16 %v175_v1, %v173_v0 }
 0x12e   :  { %v178_v5 = vpack.c.bf16 %v176_v3, %v174_v2 }
 0x130   :  { %415 = vmatprep.mubr.bf16.mxu1 %v178_v5 }
 0x131   :  { %416 = vmatmul.mubr.bf16.vlgmr.msra.gmra.mrb[0].mxu1 %v177_v4 }
 0x204   :  { %v417_v14 = vpop.f32.mrb[0].mxu1 }
 0x205   :  { %v418_v15 = vadd.f32 %v417_v14, %v216_v12  ;;  %v419_v16 = vpop.f32.mrb[1].mxu1 }
 0x206   :  { %v420_v17 = vadd.f32 %v419_v16, %v220_v13  ;;  %v421_v18 = vpop.f32.mrb[2].mxu1 }
 0x207   :  { %v422_v19 = vadd.f32 %v421_v18, %v216_v12  ;;  %v423_v20 = vpop.f32.mrb[3].mxu1  ;;  %v426_v22 = vmax.f32 %v418_v15, 0.0 }
 0x208   :  { %v424_v21 = vadd.f32 %v423_v20, %v220_v13  ;;  %v427_v24 = vmax.f32 %v420_v17, 0.0 }
 0x209   :  { %v428_v23 = vmax.f32 %v422_v19, 0.0 }
 0x20a   :  { %v429_v25 = vmax.f32 %v424_v21, 0.0 }
 0x20b   :  { %v430_v26 = vpack.c.bf16 %v428_v23, %v426_v22 }
 0x20c   :  { %v431_v27 = vpack.c.bf16 %v429_v25, %v427_v24 }
 0x20e   :  { %599 = vmatprep.mubr.bf16.mxu0 %v431_v27 }
 0x20f   :  { %600 = vmatmul.mubr.bf16.vlgmr.msra.gmra.mrb[4].mxu0 %v430_v26 }
 0x2e2   :  { %v717_v28 = vpop.f32.mrb[4].mxu0 }
 0x2e3   :  { %v718_v29 = vpop.f32.mrb[5].mxu0 }
 0x2e4   :  { %v719_v30 = vadd.f32 %v718_v29, %v717_v28  ;;  %v720_v31 = vpop.f32.mrb[6].mxu0 }
 0x2e5   :  { %v721_v33 = vpop.f32.mrb[7].mxu0 }
 0x2e6   :  { %v722_v34 = vadd.f32 %v721_v33, %v720_v31  ;;  %v602_v35 = vadd.f32 %v719_v30, %v675_v32 }
 0x2e8   :  { %v605_v36 = vadd.f32 %v722_v34, %v675_v32 }
 0x2ea   :  { %v699_v37 = vpack.c.bf16 %v605_v36, %v602_v35 }
 0x2ec   :  { %700 = vst [vmem:[#allocation10] sm:$0xff] %v699_v37  }
 0x2ed   :  { %903 = shalt.err (!%p900_p8)
}
 0x2ee   :  { %s904_s6 = scalar_lea.hbm %s1070_s7, 128 }
 0x2ef   :  { %p905_p9 = scmp.ne.s32.totalorder %s1070_s7, %s904_s6  ;;  %p908_p10 = scmp.lt.u32.totalorder %s904_s6, %s1070_s7 }
 0x2f1   :  { %p910_p11 = pnand %p908_p10, %p905_p9 }
 0x2f3   :  { %913 = shalt.err (!%p910_p11)
}
 0x2f4   :  { %629 = dma.vmem_to_hbm [thread:$0]  %s624_s9, 128, %s1070_s7, [#allocation4], %s926_s1, %s926_s1, %s927_s25  }
 0x2f5   :  { %920 = dma.done.wait [#allocation4], 128  }
 0x2f6   :  { %921 = vsyncadd [#allocation4], 4294967168 }
 0x2f7   :  { %633 = vsyncpa [#allocation3], 1 }
 0x2f8   :  { %634 = vsyncpa [#allocation6], 1 }
 0x2f9   :  { %635 = vsyncpa [#allocation9], 1 }
 0x2fa   :  { %636 = vsyncpa [#allocation4], 1 }

</bundles_post_ra>
